<compile_context>
chip_gen: v7x
topology: tpu7x:2x2x1
jax: 0.10.0
libtpu: 0.0.40
codegen_flags: <defaults>
</compile_context>

<pallas_src>
import jax
import jax.numpy as jnp
from jax import lax
from jax.experimental import pallas as pl
from jax.experimental.pallas import tpu as pltpu


def gibberish_lstm_kernel(xproj_ref, whh_ref, wlin_ref, blin_ref, out_ref):
    """LSTM recurrence (input projection pre-hoisted) + Linear + Sigmoid.

    xproj_ref : [T, Bp, 4H]  precomputed x_t @ W_ih_scaled + b_scaled (g cols *2)
    whh_ref   : [H, 4H]      transposed PyTorch weight_hh_l0, g cols pre-scaled *2
    wlin_ref  : [1, H]       Linear weight as a row vector (VMEM)
    blin_ref  : [1, 1]       Linear bias (SMEM scalar)
    out_ref   : [Bp, 1]      sigmoid(Linear(h_T))
    """
    T = xproj_ref.shape[0]
    Bp = xproj_ref.shape[1]
    H = whh_ref.shape[0]

    # Hoist weight / constant loads out of the unrolled recurrence — Pallas
    # does not CSE ref loads across iterations, so read them once into vregs.
    whh = whh_ref[...]            # [H, 4H] stays resident
    wlin = wlin_ref[...]          # [1, H]
    blin = blin_ref[0, 0]         # scalar from SMEM

    # Recurrent state lives in vregs (carried values), not VMEM scratch.
    h = jnp.zeros((Bp, H), jnp.float32)
    c = jnp.zeros((Bp, H), jnp.float32)

    # Fully unrolled recurrence: T is small and static.
    for t in range(T):
        gates = xproj_ref[t] + jnp.dot(
            h, whh, preferred_element_type=jnp.float32)       # [Bp, 4H]
        # ONE full-vreg sigmoid for all four gates. The g-gate columns were
        # pre-scaled by 2 in the wrapper, so tanh(x) = 2*sigmoid(2x) - 1.
        s = jax.nn.sigmoid(gates)                              # one EUP push
        # PyTorch gate order: i, f, g, o
        i_g = s[:, 0 * H:1 * H]
        f_g = s[:, 1 * H:2 * H]
        g_g = 2.0 * s[:, 2 * H:3 * H] - 1.0                    # tanh via fma
        o_g = s[:, 3 * H:4 * H]
        c = f_g * c + i_g * g_g
        h = o_g * jnp.tanh(c)

    # Decider: Linear(H -> 1) + Sigmoid on the last timestep's hidden state,
    # computed as a VPU multiply + lane reduction (no 1-column MXU matmul).
    logits = jnp.sum(h * wlin, axis=-1, keepdims=True) + blin
    out_ref[...] = jax.nn.sigmoid(logits)


def gibberish_estimator_forward(words_windows, params):
    """words_windows: [B, T] int32 token ids. Returns [B, 1] float32."""
    emb_table = params["embedding"]          # [V, E]
    w_ih = params["w_ih"]                    # [E, 4H]
    w_hh = params["w_hh"]                    # [H, 4H]
    b = params["b"]                          # [1, 4H]
    w_lin = params["w_lin"]                  # [H, 1]
    b_lin = params["b_lin"]                  # [1, 1]

    B, T = words_windows.shape
    H = w_hh.shape[0]

    # Pre-scale the g-gate columns (2H:3H) by 2 so the kernel can compute all
    # four gate activations with a single sigmoid (tanh(x) = 2*sigmoid(2x)-1).
    g_scale = jnp.concatenate(
        [jnp.ones((1, 2 * H), jnp.float32),
         jnp.full((1, H), 2.0, jnp.float32),
         jnp.ones((1, H), jnp.float32)], axis=1)               # [1, 4H]
    w_ih_s = w_ih * g_scale
    w_hh_s = w_hh * g_scale
    b_s = b * g_scale

    # Embedding gather with the time-major transpose folded in: [T, B, E].
    x_tm = jnp.take(emb_table, words_windows.T, axis=0)

    # Pad the batch to a full sublane tile (multiple of 8). Padded rows get
    # gates == bias (garbage outputs), intentionally discarded by out[:B].
    Bp = ((B + 7) // 8) * 8
    if Bp != B:
        x_tm = jnp.pad(x_tm, ((0, 0), (0, Bp - B), (0, 0)))

    # Hoist the input projection + bias out of the serial recurrence:
    # one [T*Bp, E] x [E, 4H] MXU matmul instead of one per timestep.
    xproj = jnp.einsum("tbe,eg->tbg", x_tm, w_ih_s,
                       preferred_element_type=jnp.float32) + b_s   # [T, Bp, 4H]

    w_lin_row = w_lin.T                      # [1, H]

    out = pl.pallas_call(
        gibberish_lstm_kernel,
        out_shape=jax.ShapeDtypeStruct((Bp, 1), jnp.float32),
        in_specs=[
            pl.BlockSpec(memory_space=pltpu.MemorySpace.VMEM),   # xproj
            pl.BlockSpec(memory_space=pltpu.MemorySpace.VMEM),   # w_hh (scaled)
            pl.BlockSpec(memory_space=pltpu.MemorySpace.VMEM),   # w_lin row
            pl.BlockSpec(memory_space=pltpu.MemorySpace.SMEM),   # b_lin scalar
        ],
        out_specs=pl.BlockSpec(memory_space=pltpu.MemorySpace.VMEM),
    )(xproj, w_hh_s, w_lin_row, b_lin)
    return out[:B]


def make_params(key, vocab_size, emb_dim, hidden):
    ks = jax.random.split(key, 7)
    scale = 0.1
    params = {
        "embedding": jax.random.normal(ks[0], (vocab_size, emb_dim), jnp.float32) * scale,
        # stored already transposed for the kernel: [E, 4H], [H, 4H]
        "w_ih": jax.random.normal(ks[1], (emb_dim, 4 * hidden), jnp.float32) * scale,
        "w_hh": jax.random.normal(ks[2], (hidden, 4 * hidden), jnp.float32) * scale,
        # b = bias_ih + bias_hh (combined), kept 2D
        "b": (jax.random.normal(ks[3], (1, 4 * hidden), jnp.float32) * scale
              + jax.random.normal(ks[4], (1, 4 * hidden), jnp.float32) * scale),
        "w_lin": jax.random.normal(ks[5], (hidden, 1), jnp.float32) * scale,
        "b_lin": jax.random.normal(ks[6], (1, 1), jnp.float32) * scale,
    }
    return params


def reference_forward(words_windows, params):
    """Pure-JAX reference (mirrors torch LSTM + Linear + Sigmoid semantics)."""
    x = jnp.take(params["embedding"], words_windows, axis=0)  # [B, T, E]
    B, T, E = x.shape
    H = params["w_hh"].shape[0]
    h = jnp.zeros((B, H), jnp.float32)
    c = jnp.zeros((B, H), jnp.float32)

    def step(carry, x_t):
        h, c = carry
        gates = x_t @ params["w_ih"] + h @ params["w_hh"] + params["b"]
        i = jax.nn.sigmoid(gates[:, 0 * H:1 * H])
        f = jax.nn.sigmoid(gates[:, 1 * H:2 * H])
        g = jnp.tanh(gates[:, 2 * H:3 * H])
        o = jax.nn.sigmoid(gates[:, 3 * H:4 * H])
        c = f * c + i * g
        h = o * jnp.tanh(c)
        return (h, c), h

    (h, c), _ = lax.scan(step, (h, c), jnp.transpose(x, (1, 0, 2)))
    return jax.nn.sigmoid(h @ params["w_lin"] + params["b_lin"])


if __name__ == "__main__":
    key = jax.random.PRNGKey(0)
    B, T = 2, 8            # batch of word windows, window length
    vocab_size, emb_dim, hidden = 50, 32, 32

    k_params, k_idx = jax.random.split(key)
    params = make_params(k_params, vocab_size, emb_dim, hidden)
    words_windows = jax.random.randint(k_idx, (B, T), 0, vocab_size, jnp.int32)

    out = gibberish_estimator_forward(words_windows, params)
    out = jax.block_until_ready(out)

    ref = reference_forward(words_windows, params)
    assert out.shape == (B, 1)
    # Slightly looser tolerance: tanh is computed as 2*sigmoid(2x)-1 in the
    # kernel (mathematically exact, differs by ULPs from jnp.tanh).
    assert jnp.allclose(out, ref, atol=1e-4, rtol=1e-4), (out, ref)

    print("KERNEL_OK")
</pallas_src>

<mosaic_0001>
module attributes {stable_mosaic.version = 11 : i64} {
  func.func @gibberish_lstm_kernel(%arg0: memref<8x8x128xf32, #tpu.memory_space<vmem>>, %arg1: memref<32x128xf32, #tpu.memory_space<vmem>>, %arg2: memref<1x32xf32, #tpu.memory_space<vmem>>, %arg3: memref<1x1xf32, #tpu.memory_space<smem>>, %arg4: memref<8x1xf32, #tpu.memory_space<vmem>>) attributes {dimension_semantics = [], scalar_prefetch = 0 : i64, scratch_operands = 0 : i64, tpu.core_type = #tpu.core_type<tc>} {
    %c0 = arith.constant 0 : index
    %c0_0 = arith.constant 0 : index
    %0 = vector.load %arg1[%c0, %c0_0] : memref<32x128xf32, #tpu.memory_space<vmem>>, vector<32x128xf32>
    %c0_1 = arith.constant 0 : index
    %c0_2 = arith.constant 0 : index
    %1 = vector.load %arg2[%c0_1, %c0_2] : memref<1x32xf32, #tpu.memory_space<vmem>>, vector<1x32xf32>
    %c0_3 = arith.constant 0 : index
    %c0_4 = arith.constant 0 : index
    %2 = memref.load %arg3[%c0_3, %c0_4] : memref<1x1xf32, #tpu.memory_space<smem>>
    %cst = arith.constant 0.000000e+00 : f32
    %3 = vector.broadcast %cst : f32 to vector<8x32xf32>
    %cst_5 = arith.constant 0.000000e+00 : f32
    %4 = vector.broadcast %cst_5 : f32 to vector<8x32xf32>
    %c0_6 = arith.constant 0 : index
    %c0_7 = arith.constant 0 : index
    %c0_8 = arith.constant 0 : index
    %5 = vector.load %arg0[%c0_6, %c0_7, %c0_8] : memref<8x8x128xf32, #tpu.memory_space<vmem>>, vector<1x8x128xf32>
    %6 = vector.shape_cast %5 : vector<1x8x128xf32> to vector<8x128xf32>
    %cst_9 = arith.constant dense<0.000000e+00> : vector<8x128xf32>
    %7 = tpu.matmul %3, %0, %cst_9 {dimension_numbers = #tpu.dot_dimension_numbers<[1], [0], [0], [1], [0, 0, 1, 1], [], []>} : vector<8x32xf32>, vector<32x128xf32>, vector<8x128xf32> -> vector<8x128xf32>
    %8 = arith.addf %6, %7 : vector<8x128xf32>
    %9 = arith.negf %8 : vector<8x128xf32>
    %10 = math.exp %9 : vector<8x128xf32>
    %cst_10 = arith.constant 1.000000e+00 : f32
    %11 = vector.broadcast %cst_10 : f32 to vector<8x128xf32>
    %12 = arith.addf %11, %10 : vector<8x128xf32>
    %13 = arith.divf %11, %12 : vector<8x128xf32>
    %14 = vector.extract_strided_slice %13 {offsets = [0, 0], sizes = [8, 32], strides = [1, 1]} : vector<8x128xf32> to vector<8x32xf32>
    %15 = vector.extract_strided_slice %13 {offsets = [0, 32], sizes = [8, 32], strides = [1, 1]} : vector<8x128xf32> to vector<8x32xf32>
    %16 = vector.extract_strided_slice %13 {offsets = [0, 64], sizes = [8, 32], strides = [1, 1]} : vector<8x128xf32> to vector<8x32xf32>
    %cst_11 = arith.constant 2.000000e+00 : f32
    %17 = vector.broadcast %cst_11 : f32 to vector<8x32xf32>
    %18 = arith.mulf %17, %16 : vector<8x32xf32>
    %cst_12 = arith.constant 1.000000e+00 : f32
    %19 = vector.broadcast %cst_12 : f32 to vector<8x32xf32>
    %20 = arith.subf %18, %19 : vector<8x32xf32>
    %21 = vector.extract_strided_slice %13 {offsets = [0, 96], sizes = [8, 32], strides = [1, 1]} : vector<8x128xf32> to vector<8x32xf32>
    %22 = arith.mulf %15, %4 : vector<8x32xf32>
    %23 = arith.mulf %14, %20 : vector<8x32xf32>
    %24 = arith.addf %22, %23 : vector<8x32xf32>
    %25 = math.tanh %24 : vector<8x32xf32>
    %26 = arith.mulf %21, %25 : vector<8x32xf32>
    %c1 = arith.constant 1 : index
    %c0_13 = arith.constant 0 : index
    %c0_14 = arith.constant 0 : index
    %27 = vector.load %arg0[%c1, %c0_13, %c0_14] : memref<8x8x128xf32, #tpu.memory_space<vmem>>, vector<1x8x128xf32>
    %28 = vector.shape_cast %27 : vector<1x8x128xf32> to vector<8x128xf32>
    %cst_15 = arith.constant dense<0.000000e+00> : vector<8x128xf32>
    %29 = tpu.matmul %26, %0, %cst_15 {dimension_numbers = #tpu.dot_dimension_numbers<[1], [0], [0], [1], [0, 0, 1, 1], [], []>} : vector<8x32xf32>, vector<32x128xf32>, vector<8x128xf32> -> vector<8x128xf32>
    %30 = arith.addf %28, %29 : vector<8x128xf32>
    %31 = arith.negf %30 : vector<8x128xf32>
    %32 = math.exp %31 : vector<8x128xf32>
    %cst_16 = arith.constant 1.000000e+00 : f32
    %33 = vector.broadcast %cst_16 : f32 to vector<8x128xf32>
    %34 = arith.addf %33, %32 : vector<8x128xf32>
    %35 = arith.divf %33, %34 : vector<8x128xf32>
    %36 = vector.extract_strided_slice %35 {offsets = [0, 0], sizes = [8, 32], strides = [1, 1]} : vector<8x128xf32> to vector<8x32xf32>
    %37 = vector.extract_strided_slice %35 {offsets = [0, 32], sizes = [8, 32], strides = [1, 1]} : vector<8x128xf32> to vector<8x32xf32>
    %38 = vector.extract_strided_slice %35 {offsets = [0, 64], sizes = [8, 32], strides = [1, 1]} : vector<8x128xf32> to vector<8x32xf32>
    %cst_17 = arith.constant 2.000000e+00 : f32
    %39 = vector.broadcast %cst_17 : f32 to vector<8x32xf32>
    %40 = arith.mulf %39, %38 : vector<8x32xf32>
    %cst_18 = arith.constant 1.000000e+00 : f32
    %41 = vector.broadcast %cst_18 : f32 to vector<8x32xf32>
    %42 = arith.subf %40, %41 : vector<8x32xf32>
    %43 = vector.extract_strided_slice %35 {offsets = [0, 96], sizes = [8, 32], strides = [1, 1]} : vector<8x128xf32> to vector<8x32xf32>
    %44 = arith.mulf %37, %24 : vector<8x32xf32>
    %45 = arith.mulf %36, %42 : vector<8x32xf32>
    %46 = arith.addf %44, %45 : vector<8x32xf32>
    %47 = math.tanh %46 : vector<8x32xf32>
    %48 = arith.mulf %43, %47 : vector<8x32xf32>
    %c2 = arith.constant 2 : index
    %c0_19 = arith.constant 0 : index
    %c0_20 = arith.constant 0 : index
    %49 = vector.load %arg0[%c2, %c0_19, %c0_20] : memref<8x8x128xf32, #tpu.memory_space<vmem>>, vector<1x8x128xf32>
    %50 = vector.shape_cast %49 : vector<1x8x128xf32> to vector<8x128xf32>
    %cst_21 = arith.constant dense<0.000000e+00> : vector<8x128xf32>
    %51 = tpu.matmul %48, %0, %cst_21 {dimension_numbers = #tpu.dot_dimension_numbers<[1], [0], [0], [1], [0, 0, 1, 1], [], []>} : vector<8x32xf32>, vector<32x128xf32>, vector<8x128xf32> -> vector<8x128xf32>
    %52 = arith.addf %50, %51 : vector<8x128xf32>
    %53 = arith.negf %52 : vector<8x128xf32>
    %54 = math.exp %53 : vector<8x128xf32>
    %cst_22 = arith.constant 1.000000e+00 : f32
    %55 = vector.broadcast %cst_22 : f32 to vector<8x128xf32>
    %56 = arith.addf %55, %54 : vector<8x128xf32>
    %57 = arith.divf %55, %56 : vector<8x128xf32>
    %58 = vector.extract_strided_slice %57 {offsets = [0, 0], sizes = [8, 32], strides = [1, 1]} : vector<8x128xf32> to vector<8x32xf32>
    %59 = vector.extract_strided_slice %57 {offsets = [0, 32], sizes = [8, 32], strides = [1, 1]} : vector<8x128xf32> to vector<8x32xf32>
    %60 = vector.extract_strided_slice %57 {offsets = [0, 64], sizes = [8, 32], strides = [1, 1]} : vector<8x128xf32> to vector<8x32xf32>
    %cst_23 = arith.constant 2.000000e+00 : f32
    %61 = vector.broadcast %cst_23 : f32 to vector<8x32xf32>
    %62 = arith.mulf %61, %60 : vector<8x32xf32>
    %cst_24 = arith.constant 1.000000e+00 : f32
    %63 = vector.broadcast %cst_24 : f32 to vector<8x32xf32>
    %64 = arith.subf %62, %63 : vector<8x32xf32>
    %65 = vector.extract_strided_slice %57 {offsets = [0, 96], sizes = [8, 32], strides = [1, 1]} : vector<8x128xf32> to vector<8x32xf32>
    %66 = arith.mulf %59, %46 : vector<8x32xf32>
    %67 = arith.mulf %58, %64 : vector<8x32xf32>
    %68 = arith.addf %66, %67 : vector<8x32xf32>
    %69 = math.tanh %68 : vector<8x32xf32>
    %70 = arith.mulf %65, %69 : vector<8x32xf32>
    %c3 = arith.constant 3 : index
    %c0_25 = arith.constant 0 : index
    %c0_26 = arith.constant 0 : index
    %71 = vector.load %arg0[%c3, %c0_25, %c0_26] : memref<8x8x128xf32, #tpu.memory_space<vmem>>, vector<1x8x128xf32>
    %72 = vector.shape_cast %71 : vector<1x8x128xf32> to vector<8x128xf32>
    %cst_27 = arith.constant dense<0.000000e+00> : vector<8x128xf32>
    %73 = tpu.matmul %70, %0, %cst_27 {dimension_numbers = #tpu.dot_dimension_numbers<[1], [0], [0], [1], [0, 0, 1, 1], [], []>} : vector<8x32xf32>, vector<32x128xf32>, vector<8x128xf32> -> vector<8x128xf32>
    %74 = arith.addf %72, %73 : vector<8x128xf32>
    %75 = arith.negf %74 : vector<8x128xf32>
    %76 = math.exp %75 : vector<8x128xf32>
    %cst_28 = arith.constant 1.000000e+00 : f32
    %77 = vector.broadcast %cst_28 : f32 to vector<8x128xf32>
    %78 = arith.addf %77, %76 : vector<8x128xf32>
    %79 = arith.divf %77, %78 : vector<8x128xf32>
    %80 = vector.extract_strided_slice %79 {offsets = [0, 0], sizes = [8, 32], strides = [1, 1]} : vector<8x128xf32> to vector<8x32xf32>
    %81 = vector.extract_strided_slice %79 {offsets = [0, 32], sizes = [8, 32], strides = [1, 1]} : vector<8x128xf32> to vector<8x32xf32>
    %82 = vector.extract_strided_slice %79 {offsets = [0, 64], sizes = [8, 32], strides = [1, 1]} : vector<8x128xf32> to vector<8x32xf32>
    %cst_29 = arith.constant 2.000000e+00 : f32
    %83 = vector.broadcast %cst_29 : f32 to vector<8x32xf32>
    %84 = arith.mulf %83, %82 : vector<8x32xf32>
    %cst_30 = arith.constant 1.000000e+00 : f32
    %85 = vector.broadcast %cst_30 : f32 to vector<8x32xf32>
    %86 = arith.subf %84, %85 : vector<8x32xf32>
    %87 = vector.extract_strided_slice %79 {offsets = [0, 96], sizes = [8, 32], strides = [1, 1]} : vector<8x128xf32> to vector<8x32xf32>
    %88 = arith.mulf %81, %68 : vector<8x32xf32>
    %89 = arith.mulf %80, %86 : vector<8x32xf32>
    %90 = arith.addf %88, %89 : vector<8x32xf32>
    %91 = math.tanh %90 : vector<8x32xf32>
    %92 = arith.mulf %87, %91 : vector<8x32xf32>
    %c4 = arith.constant 4 : index
    %c0_31 = arith.constant 0 : index
    %c0_32 = arith.constant 0 : index
    %93 = vector.load %arg0[%c4, %c0_31, %c0_32] : memref<8x8x128xf32, #tpu.memory_space<vmem>>, vector<1x8x128xf32>
    %94 = vector.shape_cast %93 : vector<1x8x128xf32> to vector<8x128xf32>
    %cst_33 = arith.constant dense<0.000000e+00> : vector<8x128xf32>
    %95 = tpu.matmul %92, %0, %cst_33 {dimension_numbers = #tpu.dot_dimension_numbers<[1], [0], [0], [1], [0, 0, 1, 1], [], []>} : vector<8x32xf32>, vector<32x128xf32>, vector<8x128xf32> -> vector<8x128xf32>
    %96 = arith.addf %94, %95 : vector<8x128xf32>
    %97 = arith.negf %96 : vector<8x128xf32>
    %98 = math.exp %97 : vector<8x128xf32>
    %cst_34 = arith.constant 1.000000e+00 : f32
    %99 = vector.broadcast %cst_34 : f32 to vector<8x128xf32>
    %100 = arith.addf %99, %98 : vector<8x128xf32>
    %101 = arith.divf %99, %100 : vector<8x128xf32>
    %102 = vector.extract_strided_slice %101 {offsets = [0, 0], sizes = [8, 32], strides = [1, 1]} : vector<8x128xf32> to vector<8x32xf32>
    %103 = vector.extract_strided_slice %101 {offsets = [0, 32], sizes = [8, 32], strides = [1, 1]} : vector<8x128xf32> to vector<8x32xf32>
    %104 = vector.extract_strided_slice %101 {offsets = [0, 64], sizes = [8, 32], strides = [1, 1]} : vector<8x128xf32> to vector<8x32xf32>
    %cst_35 = arith.constant 2.000000e+00 : f32
    %105 = vector.broadcast %cst_35 : f32 to vector<8x32xf32>
    %106 = arith.mulf %105, %104 : vector<8x32xf32>
    %cst_36 = arith.constant 1.000000e+00 : f32
    %107 = vector.broadcast %cst_36 : f32 to vector<8x32xf32>
    %108 = arith.subf %106, %107 : vector<8x32xf32>
    %109 = vector.extract_strided_slice %101 {offsets = [0, 96], sizes = [8, 32], strides = [1, 1]} : vector<8x128xf32> to vector<8x32xf32>
    %110 = arith.mulf %103, %90 : vector<8x32xf32>
    %111 = arith.mulf %102, %108 : vector<8x32xf32>
    %112 = arith.addf %110, %111 : vector<8x32xf32>
    %113 = math.tanh %112 : vector<8x32xf32>
    %114 = arith.mulf %109, %113 : vector<8x32xf32>
    %c5 = arith.constant 5 : index
    %c0_37 = arith.constant 0 : index
    %c0_38 = arith.constant 0 : index
    %115 = vector.load %arg0[%c5, %c0_37, %c0_38] : memref<8x8x128xf32, #tpu.memory_space<vmem>>, vector<1x8x128xf32>
    %116 = vector.shape_cast %115 : vector<1x8x128xf32> to vector<8x128xf32>
    %cst_39 = arith.constant dense<0.000000e+00> : vector<8x128xf32>
    %117 = tpu.matmul %114, %0, %cst_39 {dimension_numbers = #tpu.dot_dimension_numbers<[1], [0], [0], [1], [0, 0, 1, 1], [], []>} : vector<8x32xf32>, vector<32x128xf32>, vector<8x128xf32> -> vector<8x128xf32>
    %118 = arith.addf %116, %117 : vector<8x128xf32>
    %119 = arith.negf %118 : vector<8x128xf32>
    %120 = math.exp %119 : vector<8x128xf32>
    %cst_40 = arith.constant 1.000000e+00 : f32
    %121 = vector.broadcast %cst_40 : f32 to vector<8x128xf32>
    %122 = arith.addf %121, %120 : vector<8x128xf32>
    %123 = arith.divf %121, %122 : vector<8x128xf32>
    %124 = vector.extract_strided_slice %123 {offsets = [0, 0], sizes = [8, 32], strides = [1, 1]} : vector<8x128xf32> to vector<8x32xf32>
    %125 = vector.extract_strided_slice %123 {offsets = [0, 32], sizes = [8, 32], strides = [1, 1]} : vector<8x128xf32> to vector<8x32xf32>
    %126 = vector.extract_strided_slice %123 {offsets = [0, 64], sizes = [8, 32], strides = [1, 1]} : vector<8x128xf32> to vector<8x32xf32>
    %cst_41 = arith.constant 2.000000e+00 : f32
    %127 = vector.broadcast %cst_41 : f32 to vector<8x32xf32>
    %128 = arith.mulf %127, %126 : vector<8x32xf32>
    %cst_42 = arith.constant 1.000000e+00 : f32
    %129 = vector.broadcast %cst_42 : f32 to vector<8x32xf32>
    %130 = arith.subf %128, %129 : vector<8x32xf32>
    %131 = vector.extract_strided_slice %123 {offsets = [0, 96], sizes = [8, 32], strides = [1, 1]} : vector<8x128xf32> to vector<8x32xf32>
    %132 = arith.mulf %125, %112 : vector<8x32xf32>
    %133 = arith.mulf %124, %130 : vector<8x32xf32>
    %134 = arith.addf %132, %133 : vector<8x32xf32>
    %135 = math.tanh %134 : vector<8x32xf32>
    %136 = arith.mulf %131, %135 : vector<8x32xf32>
    %c6 = arith.constant 6 : index
    %c0_43 = arith.constant 0 : index
    %c0_44 = arith.constant 0 : index
    %137 = vector.load %arg0[%c6, %c0_43, %c0_44] : memref<8x8x128xf32, #tpu.memory_space<vmem>>, vector<1x8x128xf32>
    %138 = vector.shape_cast %137 : vector<1x8x128xf32> to vector<8x128xf32>
    %cst_45 = arith.constant dense<0.000000e+00> : vector<8x128xf32>
    %139 = tpu.matmul %136, %0, %cst_45 {dimension_numbers = #tpu.dot_dimension_numbers<[1], [0], [0], [1], [0, 0, 1, 1], [], []>} : vector<8x32xf32>, vector<32x128xf32>, vector<8x128xf32> -> vector<8x128xf32>
    %140 = arith.addf %138, %139 : vector<8x128xf32>
    %141 = arith.negf %140 : vector<8x128xf32>
    %142 = math.exp %141 : vector<8x128xf32>
    %cst_46 = arith.constant 1.000000e+00 : f32
    %143 = vector.broadcast %cst_46 : f32 to vector<8x128xf32>
    %144 = arith.addf %143, %142 : vector<8x128xf32>
    %145 = arith.divf %143, %144 : vector<8x128xf32>
    %146 = vector.extract_strided_slice %145 {offsets = [0, 0], sizes = [8, 32], strides = [1, 1]} : vector<8x128xf32> to vector<8x32xf32>
    %147 = vector.extract_strided_slice %145 {offsets = [0, 32], sizes = [8, 32], strides = [1, 1]} : vector<8x128xf32> to vector<8x32xf32>
    %148 = vector.extract_strided_slice %145 {offsets = [0, 64], sizes = [8, 32], strides = [1, 1]} : vector<8x128xf32> to vector<8x32xf32>
    %cst_47 = arith.constant 2.000000e+00 : f32
    %149 = vector.broadcast %cst_47 : f32 to vector<8x32xf32>
    %150 = arith.mulf %149, %148 : vector<8x32xf32>
    %cst_48 = arith.constant 1.000000e+00 : f32
    %151 = vector.broadcast %cst_48 : f32 to vector<8x32xf32>
    %152 = arith.subf %150, %151 : vector<8x32xf32>
    %153 = vector.extract_strided_slice %145 {offsets = [0, 96], sizes = [8, 32], strides = [1, 1]} : vector<8x128xf32> to vector<8x32xf32>
    %154 = arith.mulf %147, %134 : vector<8x32xf32>
    %155 = arith.mulf %146, %152 : vector<8x32xf32>
    %156 = arith.addf %154, %155 : vector<8x32xf32>
    %157 = math.tanh %156 : vector<8x32xf32>
    %158 = arith.mulf %153, %157 : vector<8x32xf32>
    %c7 = arith.constant 7 : index
    %c0_49 = arith.constant 0 : index
    %c0_50 = arith.constant 0 : index
    %159 = vector.load %arg0[%c7, %c0_49, %c0_50] : memref<8x8x128xf32, #tpu.memory_space<vmem>>, vector<1x8x128xf32>
    %160 = vector.shape_cast %159 : vector<1x8x128xf32> to vector<8x128xf32>
    %cst_51 = arith.constant dense<0.000000e+00> : vector<8x128xf32>
    %161 = tpu.matmul %158, %0, %cst_51 {dimension_numbers = #tpu.dot_dimension_numbers<[1], [0], [0], [1], [0, 0, 1, 1], [], []>} : vector<8x32xf32>, vector<32x128xf32>, vector<8x128xf32> -> vector<8x128xf32>
    %162 = arith.addf %160, %161 : vector<8x128xf32>
    %163 = arith.negf %162 : vector<8x128xf32>
    %164 = math.exp %163 : vector<8x128xf32>
    %cst_52 = arith.constant 1.000000e+00 : f32
    %165 = vector.broadcast %cst_52 : f32 to vector<8x128xf32>
    %166 = arith.addf %165, %164 : vector<8x128xf32>
    %167 = arith.divf %165, %166 : vector<8x128xf32>
    %168 = vector.extract_strided_slice %167 {offsets = [0, 0], sizes = [8, 32], strides = [1, 1]} : vector<8x128xf32> to vector<8x32xf32>
    %169 = vector.extract_strided_slice %167 {offsets = [0, 32], sizes = [8, 32], strides = [1, 1]} : vector<8x128xf32> to vector<8x32xf32>
    %170 = vector.extract_strided_slice %167 {offsets = [0, 64], sizes = [8, 32], strides = [1, 1]} : vector<8x128xf32> to vector<8x32xf32>
    %cst_53 = arith.constant 2.000000e+00 : f32
    %171 = vector.broadcast %cst_53 : f32 to vector<8x32xf32>
    %172 = arith.mulf %171, %170 : vector<8x32xf32>
    %cst_54 = arith.constant 1.000000e+00 : f32
    %173 = vector.broadcast %cst_54 : f32 to vector<8x32xf32>
    %174 = arith.subf %172, %173 : vector<8x32xf32>
    %175 = vector.extract_strided_slice %167 {offsets = [0, 96], sizes = [8, 32], strides = [1, 1]} : vector<8x128xf32> to vector<8x32xf32>
    %176 = arith.mulf %169, %156 : vector<8x32xf32>
    %177 = arith.mulf %168, %174 : vector<8x32xf32>
    %178 = arith.addf %176, %177 : vector<8x32xf32>
    %179 = math.tanh %178 : vector<8x32xf32>
    %180 = arith.mulf %175, %179 : vector<8x32xf32>
    %181 = vector.broadcast %1 : vector<1x32xf32> to vector<8x32xf32>
    %182 = arith.mulf %180, %181 : vector<8x32xf32>
    %cst_55 = arith.constant dense<0.000000e+00> : vector<8xf32>
    %183 = vector.multi_reduction <add>, %182, %cst_55 [1] : vector<8x32xf32> to vector<8xf32>
    %184 = vector.shape_cast %183 : vector<8xf32> to vector<8x1xf32>
    %185 = vector.broadcast %2 : f32 to vector<8x1xf32>
    %186 = arith.addf %184, %185 : vector<8x1xf32>
    %187 = arith.negf %186 : vector<8x1xf32>
    %188 = math.exp %187 : vector<8x1xf32>
    %cst_56 = arith.constant 1.000000e+00 : f32
    %189 = vector.broadcast %cst_56 : f32 to vector<8x1xf32>
    %190 = arith.addf %189, %188 : vector<8x1xf32>
    %191 = arith.divf %189, %190 : vector<8x1xf32>
    %c0_57 = arith.constant 0 : index
    %c0_58 = arith.constant 0 : index
    %192 = vector.load %arg4[%c0_57, %c0_58] : memref<8x1xf32, #tpu.memory_space<vmem>>, vector<8x1xf32>
    tpu.vector_store %arg4[%c0_57, %c0_58], %191 {strides = array<i32>} : memref<8x1xf32, #tpu.memory_space<vmem>>, vector<8x1xf32>,
    return
  }
}

</mosaic_0001>

<bundles_post_ra>
// kernel: tpu_custom_call.1
= control target key start
LH: loop header
LB: loop body
LE: loop exit
PB: predicated region body
PF: predicated region fallthrough
CT: control target
= control target key end

     0   :  { %10 = vsyncpa [#allocation4], 0  ;;  %s1378_s0 = inlined_call_operand.hbm [shape: f32[8,8,128], index: 0, kind: input, shape index: {}]   ;;  %s1379_s1 = inlined_call_operand.hbm [shape: f32[32,128], index: 1, kind: input, shape index: {}]   ;;  %s1380_s2 = inlined_call_operand.vmem [shape: f32[1,32], index: 2, kind: input, shape index: {}]   ;;  %s1381_s3 = inlined_call_operand.<no memory space> [shape: f32[1,1], index: 3, kind: input, shape index: {}]   ;;  %s1382_s4 = inlined_call_operand.vmem [shape: f32[8,1], index: 4, kind: output, shape index: {}]  }
   0x1   :  { %11 = vsyncpa [#allocation6], 0  ;;  %s1217_s15 = smov [#allocation3]   ;;  %s1169_s19 = scalar_lea.hbm %s1378_s0, 1024 }
   0x2   :  { %s17_s16 = sshll.u32 %s1217_s15, 4  ;;  %p1170_p0 = scmp.ne.s32.totalorder %s1378_s0, %s1169_s19  ;;  %s18_s16 = int_to_ptr.vmem [resolvable:$true] %s17_s16 }
   0x3   :  { %p1173_p1 = scmp.lt.u32.totalorder %s1169_s19, %s1378_s0 }
   0x5   :  { %p1175_p2 = pnand %p1173_p1, %p1170_p0 }
   0x7   :  { %1178 = shalt.err (!%p1175_p2)
}
   0x8   :  { %s1179_s24 = scalar_lea.vmem %s18_s16, 1024  ;;  %p1184_p4 = scmp.lt.s32.totalorder %s18_s16, %s18_s16 }
   0x9   :  { %p1180_p3 = scmp.ne.s32.totalorder %s18_s16, %s1179_s24  ;;  %p1185_p5 = scmp.lt.s32.totalorder %s1179_s24, %s1179_s24 }
   0xb   :  { %p1186_p6 = por %p1185_p5, %p1184_p4 }
   0xd   :  { %p1187_p7 = pnand %p1186_p6, %p1180_p3 }
   0xf   :  { %1190 = shalt.err (!%p1187_p7)
}
  0x10   :  { %s1218_s25 = smov 128   ;;  %s1219_s26 = smov 8  }
  0x11   :  { %23 = dma.hbm_to_vmem [thread:$0]  %s1378_s0, 1024, %s18_s16, [#allocation4], %s1218_s25, %s1218_s25, %s1219_s26  }
  0x12   :  { %s1220_s29 = smov [#allocation5]   ;;  %s1191_s7 = scalar_lea.hbm %s1379_s1, 512 }
  0x13   :  { %s29_s30 = sshll.u32 %s1220_s29, 4  ;;  %p1192_p8 = scmp.ne.s32.totalorder %s1379_s1, %s1191_s7  ;;  %s30_s30 = int_to_ptr.vmem [resolvable:$true] %s29_s30 }
  0x14   :  { %p1195_p9 = scmp.lt.u32.totalorder %s1191_s7, %s1379_s1 }
  0x16   :  { %p1197_p10 = pnand %p1195_p9, %p1192_p8 }
  0x18   :  { %1200 = shalt.err (!%p1197_p10)
}
  0x19   :  { %s1201_s12 = scalar_lea.vmem %s30_s30, 512  ;;  %p1206_p12 = scmp.lt.s32.totalorder %s30_s30, %s30_s30 }
  0x1a   :  { %p1202_p11 = scmp.ne.s32.totalorder %s30_s30, %s1201_s12  ;;  %p1207_p13 = scmp.lt.s32.totalorder %s1201_s12, %s1201_s12 }
  0x1c   :  { %p1208_p0 = por %p1207_p13, %p1206_p12 }
  0x1e   :  { %p1209_p1 = pnand %p1208_p0, %p1202_p11 }
  0x20   :  { %1212 = shalt.err (!%p1209_p1)
}
  0x21   :  { %35 = dma.hbm_to_vmem [thread:$0]  %s1379_s1, 512, %s30_s30, [#allocation6], %s1218_s25, %s1218_s25, %s1219_s26  }
  0x22   :  { %1213 = dma.done.wait [#allocation4], 1024  }
  0x23   :  { %1214 = vsyncadd [#allocation4], 4294966272 }
  0x24   :  { %1215 = dma.done.wait [#allocation6], 512  }
  0x25   :  { %1216 = vsyncadd [#allocation6], 4294966784  ;;  %v1221_v0 = vmov 0.0|0.0   ;;  %vm1222_vm0 = vmmov 0   ;;  %v1223_v1 = vmov 0.0   ;;  %v46_v2 = vld [vmem:[#allocation5] sm:$0xff] }
  0x26   :  { %1059 = vmatprep.subr.bf16.mxu0 %v1221_v0  ;;  %979 = vmatprep.mubr.msk.f32.mxu0 %vm1222_vm0, %v1223_v1  ;;  %v47_v3 = vld [vmem:[#allocation5 + $0x8] sm:$0xff]  ;;  %v48_v4 = vld [vmem:[#allocation5 + $0x10] sm:$0xff]  ;;  %v49_v6 = vld [vmem:[#allocation5 + $0x18] sm:$0xff]  ;;  %s1224_s1 = smov 64   ;;  %s1225_s14 = smov 32   ;;  %vm53_vm1 = vcmask 261120  }
  0x27   :  { %1065 = vmatprep.subr.bf16.mxu1 %v1221_v0  ;;  %990 = vmatprep.mubr.msk.f32.mxu1 %vm1222_vm0, %v1223_v1  ;;  %v1282_v5 = vpack.c.bf16 %v47_v3, %v46_v2  ;;  %v1285_v7 = vpack.c.bf16 %v49_v6, %v48_v4  ;;  %v52_v8 = vld [vmem:[#allocation3] sm:$0xff]  ;;  %v154_v27 = vld [vmem:[#allocation3 + $0x8] sm:$0xff]  ;;  %v257_v46 = vld [vmem:[#allocation3 + $0x10] sm:$0xff]  ;;  %s1226_s17 = smov 96   ;;  %vm898_vm2 = vcmask 7168  }
  0x28   :  { %v360_v3 = vld [vmem:[#allocation3 + $0x18] sm:$0xff] }
  0x29   :  { %1061 = vmatpush3.bf16.msra.mxu0 %v1282_v5  ;;  %1067 = vmatpush3.bf16.msra.mxu1 %v1282_v5 }
  0x2a   :  { %1062 = vmatprep.subr.bf16.mxu0 %v1221_v0  ;;  %1068 = vmatprep.subr.bf16.mxu1 %v1221_v0 }
  0x2d   :  { %1064 = vmatpush3.bf16.msra.mxu0 %v1285_v7  ;;  %1070 = vmatpush3.bf16.msra.mxu1 %v1285_v7 }
  0x2e   :  { %1071 = vmatprep.subr.bf16.mxu0 %v1221_v0  ;;  %1077 = vmatprep.subr.bf16.mxu1 %v1221_v0 }
  0x30   :  { %980 = vmatmul.mubr.f32.vlgmr.msra.gmra.mrb[0].mxu0 %v1223_v1 }
  0x31   :  { %1073 = vmatpush3.bf16.msra.mxu0 %v1282_v5  ;;  %1001 = vmatprep.mubr.msk.f32.mxu0 %vm1222_vm0, %v1223_v1 }
  0x32   :  { %1074 = vmatprep.subr.bf16.mxu0 %v1221_v0 }
  0x35   :  { %1076 = vmatpush3.bf16.msra.mxu0 %v1285_v7 }
  0x36   :  { %1083 = vmatprep.subr.bf16.mxu0 %v1221_v0 }
 0x103   :  { %v123_v9 = vpop.f32.mrb[0].mxu0 }
 0x104   :  { %v127_v10 = vadd.f32 %v123_v9, %v52_v8  ;;  %v981_v11 = vpop.f32.mrb[1].mxu0 }
 0x106   :  { %v906_v12 = vmul.f32 -1.442695, %v127_v10 }
 0x108   :  { %1117 = vpow2.f32 %v906_v12 }
 0x112   :  { %v1118_v13 = vpop.eup %1117 }
 0x113   :  { %v131_v14 = vadd.f32 1.0, %v1118_v13 }
 0x115   :  { %1119 = vrcp.f32 %v131_v14 }
 0x11f   :  { %v1120_v15 = vpop.eup %1119 }
 0x120   :  { %v134_v16 = vmul.f32 2.0, %v1120_v15  ;;  %v136_v20 = vmul.f32 0.0, %v1120_v15 }
 0x122   :  { %v907_v17 = vadd.f32 -1.0, %v134_v16 }
 0x124   :  { %138 = vrot.lane.b32.xlu0 %v907_v17, %s1224_s1 }
 0x196   :  { %v139_v18 = vpop.permute.xlu0 %138 }
 0x197   :  { %v141_v19 = vmul.f32 %v1120_v15, %v139_v18 }
 0x199   :  { %143 = vrot.lane.b32.xlu0 %v141_v19, %s1225_s14 }
 0x20b   :  { %v144_v21 = vpop.permute.xlu0 %143 }
 0x20c   :  { %v146_v22 = vadd.f32 %v144_v21, %v136_v20 }
 0x20e   :  { %1121 = vtanh.f32 %v146_v22 }
 0x218   :  { %v1122_v23 = vpop.eup %1121 }
 0x219   :  { %149 = vrot.lane.b32.xlu1 %v1122_v23, %s1224_s1 }
 0x28b   :  { %v150_v24 = vpop.permute.xlu1 %149 }
 0x28c   :  { %v152_v25 = vmul.f32 %v1120_v15, %v150_v24  ;;  %v463_v24 = vld [vmem:[#allocation3 + $0x20] sm:$0xff] }
 0x28e   :  { %156 = vrot.lane.b32.xlu1 %v152_v25, %s1225_s14 }
 0x300   :  { %v157_v26 = vpop.permute.xlu1 %156 }
 0x301   :  { %991 = vmatmul.mubr.msk.f32.vlgmr.msra.gmra.mrb[0].mxu1 %vm53_vm1, %v157_v26 }
 0x302   :  { %1079 = vmatpush3.bf16.msra.mxu1 %v1282_v5  ;;  %1012 = vmatprep.mubr.msk.f32.mxu1 %vm1222_vm0, %v1223_v1 }
 0x303   :  { %1080 = vmatprep.subr.bf16.mxu1 %v1221_v0 }
 0x306   :  { %1082 = vmatpush3.bf16.msra.mxu1 %v1285_v7 }
 0x307   :  { %1089 = vmatprep.subr.bf16.mxu1 %v1221_v0 }
 0x3d4   :  { %v226_v28 = vpop.f32.mrb[0].mxu1 }
 0x3d5   :  { %v230_v29 = vadd.f32 %v226_v28, %v154_v27  ;;  %v992_v30 = vpop.f32.mrb[1].mxu1 }
 0x3d7   :  { %v909_v31 = vmul.f32 -1.442695, %v230_v29 }
 0x3d9   :  { %1123 = vpow2.f32 %v909_v31 }
 0x3e3   :  { %v1124_v32 = vpop.eup %1123 }
 0x3e4   :  { %v234_v33 = vadd.f32 1.0, %v1124_v32 }
 0x3e6   :  { %1125 = vrcp.f32 %v234_v33 }
 0x3f0   :  { %v1126_v34 = vpop.eup %1125 }
 0x3f1   :  { %v237_v35 = vmul.f32 2.0, %v1126_v34  ;;  %v239_v39 = vmul.f32 %v1126_v34, %v146_v22 }
 0x3f3   :  { %v910_v36 = vadd.f32 -1.0, %v237_v35 }
 0x3f5   :  { %241 = vrot.lane.b32.xlu0 %v910_v36, %s1224_s1 }
 0x467   :  { %v242_v37 = vpop.permute.xlu0 %241 }
 0x468   :  { %v244_v38 = vmul.f32 %v1126_v34, %v242_v37 }
 0x46a   :  { %246 = vrot.lane.b32.xlu1 %v244_v38, %s1225_s14 }
 0x4dc   :  { %v247_v40 = vpop.permute.xlu1 %246 }
 0x4dd   :  { %v249_v41 = vadd.f32 %v247_v40, %v239_v39 }
 0x4df   :  { %1127 = vtanh.f32 %v249_v41 }
 0x4e9   :  { %v1128_v42 = vpop.eup %1127 }
 0x4ea   :  { %252 = vrot.lane.b32.xlu0 %v1128_v42, %s1224_s1 }
 0x55c   :  { %v253_v43 = vpop.permute.xlu0 %252 }
 0x55d   :  { %v255_v44 = vmul.f32 %v1126_v34, %v253_v43  ;;  %v566_v43 = vld [vmem:[#allocation3 + $0x28] sm:$0xff] }
 0x55f   :  { %259 = vrot.lane.b32.xlu1 %v255_v44, %s1225_s14 }
 0x5d1   :  { %v260_v45 = vpop.permute.xlu1 %259 }
 0x5d2   :  { %1002 = vmatmul.mubr.msk.f32.vlgmr.msra.gmra.mrb[2].mxu0 %vm53_vm1, %v260_v45 }
 0x5d3   :  { %1085 = vmatpush3.bf16.msra.mxu0 %v1282_v5  ;;  %1023 = vmatprep.mubr.msk.f32.mxu0 %vm1222_vm0, %v1223_v1 }
 0x5d4   :  { %1086 = vmatprep.subr.bf16.mxu0 %v1221_v0 }
 0x5d7   :  { %1088 = vmatpush3.bf16.msra.mxu0 %v1285_v7 }
 0x5d8   :  { %1095 = vmatprep.subr.bf16.mxu0 %v1221_v0 }
 0x6a5   :  { %v329_v47 = vpop.f32.mrb[2].mxu0 }
 0x6a6   :  { %v333_v48 = vadd.f32 %v329_v47, %v257_v46  ;;  %v1003_v49 = vpop.f32.mrb[3].mxu0 }
 0x6a8   :  { %v912_v50 = vmul.f32 -1.442695, %v333_v48 }
 0x6aa   :  { %1129 = vpow2.f32 %v912_v50 }
 0x6b4   :  { %v1130_v51 = vpop.eup %1129 }
 0x6b5   :  { %v337_v52 = vadd.f32 1.0, %v1130_v51 }
 0x6b7   :  { %1131 = vrcp.f32 %v337_v52 }
 0x6c1   :  { %v1132_v53 = vpop.eup %1131 }
 0x6c2   :  { %v340_v54 = vmul.f32 2.0, %v1132_v53  ;;  %v342_v58 = vmul.f32 %v1132_v53, %v249_v41 }
 0x6c4   :  { %v913_v55 = vadd.f32 -1.0, %v340_v54 }
 0x6c6   :  { %344 = vrot.lane.b32.xlu0 %v913_v55, %s1224_s1 }
 0x738   :  { %v345_v56 = vpop.permute.xlu0 %344 }
 0x739   :  { %v347_v57 = vmul.f32 %v1132_v53, %v345_v56 }
 0x73b   :  { %349 = vrot.lane.b32.xlu1 %v347_v57, %s1225_s14 }
 0x7ad   :  { %v350_v59 = vpop.permute.xlu1 %349 }
 0x7ae   :  { %v352_v60 = vadd.f32 %v350_v59, %v342_v58  ;;  %v669_v58 = vld [vmem:[#allocation3 + $0x30] sm:$0xff] }
 0x7b0   :  { %1133 = vtanh.f32 %v352_v60 }
 0x7ba   :  { %v1134_v61 = vpop.eup %1133 }
 0x7bb   :  { %355 = vrot.lane.b32.xlu0 %v1134_v61, %s1224_s1 }
 0x82d   :  { %v356_v62 = vpop.permute.xlu0 %355 }
 0x82e   :  { %v358_v63 = vmul.f32 %v1132_v53, %v356_v62 }
 0x830   :  { %362 = vrot.lane.b32.xlu1 %v358_v63, %s1225_s14 }
 0x8a2   :  { %v363_v2 = vpop.permute.xlu1 %362 }
 0x8a3   :  { %1013 = vmatmul.mubr.msk.f32.vlgmr.msra.gmra.mrb[2].mxu1 %vm53_vm1, %v363_v2 }
 0x8a4   :  { %1091 = vmatpush3.bf16.msra.mxu1 %v1282_v5  ;;  %1034 = vmatprep.mubr.msk.f32.mxu1 %vm1222_vm0, %v1223_v1 }
 0x8a5   :  { %1092 = vmatprep.subr.bf16.mxu1 %v1221_v0 }
 0x8a8   :  { %1094 = vmatpush3.bf16.msra.mxu1 %v1285_v7 }
 0x8a9   :  { %1101 = vmatprep.subr.bf16.mxu1 %v1221_v0 }
 0x976   :  { %v432_v4 = vpop.f32.mrb[2].mxu1 }
 0x977   :  { %v436_v6 = vadd.f32 %v432_v4, %v360_v3  ;;  %v1014_v8 = vpop.f32.mrb[3].mxu1 }
 0x979   :  { %v915_v9 = vmul.f32 -1.442695, %v436_v6 }
 0x97b   :  { %1135 = vpow2.f32 %v915_v9 }
 0x985   :  { %v1136_v10 = vpop.eup %1135 }
 0x986   :  { %v440_v11 = vadd.f32 1.0, %v1136_v10 }
 0x988   :  { %1137 = vrcp.f32 %v440_v11 }
 0x992   :  { %v1138_v12 = vpop.eup %1137 }
 0x993   :  { %v443_v13 = vmul.f32 2.0, %v1138_v12  ;;  %v445_v17 = vmul.f32 %v1138_v12, %v352_v60 }
 0x995   :  { %v916_v14 = vadd.f32 -1.0, %v443_v13 }
 0x997   :  { %447 = vrot.lane.b32.xlu0 %v916_v14, %s1224_s1 }
 0xa09   :  { %v448_v15 = vpop.permute.xlu0 %447 }
 0xa0a   :  { %v450_v16 = vmul.f32 %v1138_v12, %v448_v15 }
 0xa0c   :  { %452 = vrot.lane.b32.xlu1 %v450_v16, %s1225_s14 }
 0xa7e   :  { %v453_v18 = vpop.permute.xlu1 %452 }
 0xa7f   :  { %v455_v19 = vadd.f32 %v453_v18, %v445_v17  ;;  %v772_v17 = vld [vmem:[#allocation3 + $0x38] sm:$0xff] }
 0xa81   :  { %1139 = vtanh.f32 %v455_v19 }
 0xa8b   :  { %v1140_v20 = vpop.eup %1139 }
 0xa8c   :  { %458 = vrot.lane.b32.xlu0 %v1140_v20, %s1224_s1 }
 0xafe   :  { %v459_v21 = vpop.permute.xlu0 %458 }
 0xaff   :  { %v461_v22 = vmul.f32 %v1138_v12, %v459_v21 }
 0xb01   :  { %465 = vrot.lane.b32.xlu1 %v461_v22, %s1225_s14 }
 0xb73   :  { %v466_v23 = vpop.permute.xlu1 %465 }
 0xb74   :  { %1024 = vmatmul.mubr.msk.f32.vlgmr.msra.gmra.mrb[4].mxu0 %vm53_vm1, %v466_v23 }
 0xb75   :  { %1097 = vmatpush3.bf16.msra.mxu0 %v1282_v5  ;;  %1045 = vmatprep.mubr.msk.f32.mxu0 %vm1222_vm0, %v1223_v1 }
 0xb76   :  { %1098 = vmatprep.subr.bf16.mxu0 %v1221_v0 }
 0xb79   :  { %1100 = vmatpush3.bf16.msra.mxu0 %v1285_v7 }
 0xc47   :  { %v535_v25 = vpop.f32.mrb[4].mxu0 }
 0xc48   :  { %v539_v26 = vadd.f32 %v535_v25, %v463_v24  ;;  %v1025_v27 = vpop.f32.mrb[5].mxu0 }
 0xc4a   :  { %v918_v28 = vmul.f32 -1.442695, %v539_v26 }
 0xc4c   :  { %1141 = vpow2.f32 %v918_v28 }
 0xc56   :  { %v1142_v29 = vpop.eup %1141 }
 0xc57   :  { %v543_v30 = vadd.f32 1.0, %v1142_v29  ;;  %v929_v29 = vld [vmem:[%s1380_s2] ss:$0 sm:$0xff] }
 0xc59   :  { %1143 = vrcp.f32 %v543_v30 }
 0xc63   :  { %v1144_v31 = vpop.eup %1143 }
 0xc64   :  { %v546_v32 = vmul.f32 2.0, %v1144_v31  ;;  %v548_v36 = vmul.f32 %v1144_v31, %v455_v19 }
 0xc66   :  { %v919_v33 = vadd.f32 -1.0, %v546_v32 }
 0xc68   :  { %550 = vrot.lane.b32.xlu0 %v919_v33, %s1224_s1 }
 0xcda   :  { %v551_v34 = vpop.permute.xlu0 %550 }
 0xcdb   :  { %v553_v35 = vmul.f32 %v1144_v31, %v551_v34 }
 0xcdd   :  { %555 = vrot.lane.b32.xlu1 %v553_v35, %s1225_s14 }
 0xd4f   :  { %v556_v37 = vpop.permute.xlu1 %555 }
 0xd50   :  { %v558_v38 = vadd.f32 %v556_v37, %v548_v36 }
 0xd52   :  { %1145 = vtanh.f32 %v558_v38 }
 0xd5c   :  { %v1146_v39 = vpop.eup %1145 }
 0xd5d   :  { %561 = vrot.lane.b32.xlu0 %v1146_v39, %s1224_s1 }
 0xdcf   :  { %v562_v40 = vpop.permute.xlu0 %561 }
 0xdd0   :  { %v564_v41 = vmul.f32 %v1144_v31, %v562_v40  ;;  %v890_v40 = vstv %s1381_s3 }
 0xdd2   :  { %568 = vrot.lane.b32.xlu1 %v564_v41, %s1225_s14 }
 0xe44   :  { %v569_v42 = vpop.permute.xlu1 %568 }
 0xe45   :  { %1035 = vmatmul.mubr.msk.f32.vlgmr.msra.gmra.mrb[4].mxu1 %vm53_vm1, %v569_v42 }
 0xe46   :  { %1103 = vmatpush3.bf16.msra.mxu1 %v1282_v5  ;;  %1056 = vmatprep.mubr.msk.f32.mxu1 %vm1222_vm0, %v1223_v1 }
 0xe47   :  { %1104 = vmatprep.subr.bf16.mxu1 %v1221_v0 }
 0xe4a   :  { %1106 = vmatpush3.bf16.msra.mxu1 %v1285_v7 }
 0xf18   :  { %v638_v44 = vpop.f32.mrb[4].mxu1 }
 0xf19   :  { %v642_v45 = vadd.f32 %v638_v44, %v566_v43  ;;  %v1036_v46 = vpop.f32.mrb[5].mxu1 }
 0xf1b   :  { %v921_v47 = vmul.f32 -1.442695, %v642_v45 }
 0xf1d   :  { %1147 = vpow2.f32 %v921_v47 }
 0xf27   :  { %v1148_v48 = vpop.eup %1147 }
 0xf28   :  { %v646_v49 = vadd.f32 1.0, %v1148_v48 }
 0xf2a   :  { %1149 = vrcp.f32 %v646_v49 }
 0xf34   :  { %v1150_v50 = vpop.eup %1149 }
 0xf35   :  { %v649_v51 = vmul.f32 2.0, %v1150_v50  ;;  %v651_v0 = vmul.f32 %v1150_v50, %v558_v38 }
 0xf37   :  { %v922_v52 = vadd.f32 -1.0, %v649_v51 }
 0xf39   :  { %653 = vrot.lane.b32.xlu0 %v922_v52, %s1224_s1 }
 0xfab   :  { %v654_v5 = vpop.permute.xlu0 %653 }
 0xfac   :  { %v656_v1 = vmul.f32 %v1150_v50, %v654_v5 }
 0xfae   :  { %658 = vrot.lane.b32.xlu1 %v656_v1, %s1225_s14 }
0x1020   :  { %v659_v7 = vpop.permute.xlu1 %658 }
0x1021   :  { %v661_v53 = vadd.f32 %v659_v7, %v651_v0 }
0x1023   :  { %1151 = vtanh.f32 %v661_v53 }
0x102d   :  { %v1152_v54 = vpop.eup %1151 }
0x102e   :  { %664 = vrot.lane.b32.xlu0 %v1152_v54, %s1224_s1 }
0x10a0   :  { %v665_v55 = vpop.permute.xlu0 %664 }
0x10a1   :  { %v667_v56 = vmul.f32 %v1150_v50, %v665_v55 }
0x10a3   :  { %671 = vrot.lane.b32.xlu1 %v667_v56, %s1225_s14 }
0x1115   :  { %v672_v57 = vpop.permute.xlu1 %671 }
0x1116   :  { %1046 = vmatmul.mubr.msk.f32.vlgmr.msra.gmra.mrb[6].mxu0 %vm53_vm1, %v672_v57 }
0x11e9   :  { %v741_v59 = vpop.f32.mrb[6].mxu0 }
0x11ea   :  { %v745_v60 = vadd.f32 %v741_v59, %v669_v58  ;;  %v1047_v61 = vpop.f32.mrb[7].mxu0 }
0x11ec   :  { %v924_v62 = vmul.f32 -1.442695, %v745_v60 }
0x11ee   :  { %1153 = vpow2.f32 %v924_v62 }
0x11f8   :  { %v1154_v63 = vpop.eup %1153 }
0x11f9   :  { %v749_v2 = vadd.f32 1.0, %v1154_v63 }
0x11fb   :  { %1155 = vrcp.f32 %v749_v2 }
0x1205   :  { %v1156_v3 = vpop.eup %1155 }
0x1206   :  { %v752_v4 = vmul.f32 2.0, %v1156_v3  ;;  %v754_v10 = vmul.f32 %v1156_v3, %v661_v53 }
0x1208   :  { %v925_v6 = vadd.f32 -1.0, %v752_v4 }
0x120a   :  { %756 = vrot.lane.b32.xlu0 %v925_v6, %s1224_s1 }
0x127c   :  { %v757_v8 = vpop.permute.xlu0 %756 }
0x127d   :  { %v759_v9 = vmul.f32 %v1156_v3, %v757_v8 }
0x127f   :  { %761 = vrot.lane.b32.xlu1 %v759_v9, %s1225_s14 }
0x12f1   :  { %v762_v11 = vpop.permute.xlu1 %761 }
0x12f2   :  { %v764_v12 = vadd.f32 %v762_v11, %v754_v10 }
0x12f4   :  { %1157 = vtanh.f32 %v764_v12 }
0x12fe   :  { %v1158_v13 = vpop.eup %1157 }
0x12ff   :  { %767 = vrot.lane.b32.xlu0 %v1158_v13, %s1224_s1 }
0x1371   :  { %v768_v14 = vpop.permute.xlu0 %767 }
0x1372   :  { %v770_v15 = vmul.f32 %v1156_v3, %v768_v14 }
0x1374   :  { %774 = vrot.lane.b32.xlu1 %v770_v15, %s1225_s14 }
0x13e6   :  { %v775_v16 = vpop.permute.xlu1 %774 }
0x13e7   :  { %1057 = vmatmul.mubr.msk.f32.vlgmr.msra.gmra.mrb[6].mxu1 %vm53_vm1, %v775_v16 }
0x14ba   :  { %v844_v18 = vpop.f32.mrb[6].mxu1 }
0x14bb   :  { %v848_v19 = vadd.f32 %v844_v18, %v772_v17  ;;  %v1058_v20 = vpop.f32.mrb[7].mxu1 }
0x14bd   :  { %v927_v21 = vmul.f32 -1.442695, %v848_v19 }
0x14bf   :  { %1159 = vpow2.f32 %v927_v21 }
0x14c9   :  { %v1160_v22 = vpop.eup %1159 }
0x14ca   :  { %v852_v23 = vadd.f32 1.0, %v1160_v22 }
0x14cc   :  { %1161 = vrcp.f32 %v852_v23 }
0x14d6   :  { %v1162_v24 = vpop.eup %1161 }
0x14d7   :  { %v855_v25 = vmul.f32 2.0, %v1162_v24  ;;  %v857_v30 = vmul.f32 %v1162_v24, %v764_v12 }
0x14d9   :  { %v928_v26 = vadd.f32 -1.0, %v855_v25 }
0x14db   :  { %859 = vrot.lane.b32.xlu0 %v928_v26, %s1224_s1 }
0x154d   :  { %v860_v27 = vpop.permute.xlu0 %859 }
0x154e   :  { %v862_v28 = vmul.f32 %v1162_v24, %v860_v27 }
0x1550   :  { %864 = vrot.lane.b32.xlu1 %v862_v28, %s1225_s14 }
0x1554   :  { %879 = vrot.lane.b32.xlu1 %v929_v29, %s1226_s17 }
0x15c2   :  { %v865_v31 = vpop.permute.xlu1 %864 }
0x15c3   :  { %v867_v32 = vadd.f32 %v865_v31, %v857_v30 }
0x15c5   :  { %1163 = vtanh.f32 %v867_v32 }
0x15c6   :  { %v880_v35 = vpop.permute.xlu1 %879 }
0x15cf   :  { %v1164_v33 = vpop.eup %1163 }
0x15d0   :  { %870 = vrot.lane.b32.xlu0 %v1164_v33, %s1224_s1 }
0x1642   :  { %v871_v34 = vpop.permute.xlu0 %870 }
0x1643   :  { %v873_v36 = vmul.f32 %v1162_v24, %v871_v34 }
0x1645   :  { %v882_v37 = vmul.f32 %v880_v35, %v873_v36 }
0x1647   :  { %884 = vrot.lane.b32.xlu0 %v882_v37, %s1225_s14 }
0x16b9   :  { %v885_v38 = vpop.permute.xlu0 %884 }
0x16ba   :  { %v887_v39 = vsel %vm53_vm1, %v885_v38, 0.0 }
0x16bb   :  { %888 = vadd.xlane.f32.xlu1 %v887_v39 }
0x1748   :  { %v889_v41 = vpop.xlane.xlu1 %888 }
0x1749   :  { %v891_v42 = vadd.f32 %v890_v40, %v889_v41 }
0x174b   :  { %v930_v43 = vmul.f32 -1.442695, %v891_v42 }
0x174d   :  { %1165 = vpow2.f32 %v930_v43 }
0x1757   :  { %v1166_v44 = vpop.eup %1165 }
0x1758   :  { %v895_v45 = vadd.f32 1.0, %v1166_v44 }
0x175a   :  { %1167 = vrcp.f32 %v895_v45 }
0x1764   :  { %v1168_v46 = vpop.eup %1167 }
0x1765   :  { %899 = vst.msk [vmem:[%s1382_s4] sm:$0xff] %vm898_vm2, %v1168_v46 }
0x1766   :  { %904 = vsyncpa [#allocation4], 1 }
0x1767   :  { %905 = vsyncpa [#allocation6], 1 }

</bundles_post_ra>
